<compile_context>
chip_gen: v7x
topology: tpu7x:2x2x1
jax: 0.10.0
libtpu: 0.0.40
codegen_flags: <defaults>
</compile_context>

<pallas_src>
import math

import jax
import jax.numpy as jnp
from jax.experimental import pallas as pl
from jax.experimental.pallas import tpu as pltpu

_LANE = 128  # TPU lane width; pad output columns to this for unmasked stores.


def _round_up(x, m):
    return ((x + m - 1) // m) * m


def _linear_kernel(x_ref, w_ref, b_ref, o_ref):
    # x_ref: [TM, D], w_ref: [D, Ppad] (resident), b_ref: [1, Ppad] (resident),
    # o_ref: [TM, Ppad]. Single MXU matmul, f32 accumulation, broadcast bias.
    acc = jnp.dot(x_ref[...], w_ref[...], preferred_element_type=jnp.float32)
    o_ref[...] = (acc + b_ref[...].astype(jnp.float32)).astype(o_ref.dtype)


def prepare_generator_params(weight, bias):
    """One-time parameter prep (do NOT call per forward pass).

    weight: [pose_dim, d_model] (PyTorch convention), bias: [pose_dim]
    Returns (w_t, b2d, pose_dim) with:
      w_t:  [d_model, p_pad]  transposed + zero-padded to a multiple of 128 cols
      b2d:  [1, p_pad]        zero-padded broadcast row
    """
    pose_dim, d_model = weight.shape
    p_pad = max(_LANE, _round_up(pose_dim, _LANE))
    w_t = jnp.zeros((d_model, p_pad), weight.dtype).at[:, :pose_dim].set(weight.T)
    b2d = jnp.zeros((1, p_pad), bias.dtype).at[0, :pose_dim].set(bias)
    return w_t, b2d, pose_dim


def generator_forward_prepared(x, w_t, b2d, pose_dim, *, tm=512):
    """y = x @ W^T + b using pre-transposed/padded params.

    x: [..., d_model]; returns [..., pose_dim].
    """
    d_model = x.shape[-1]
    lead_shape = x.shape[:-1]
    m = math.prod(lead_shape) if lead_shape else 1
    p_pad = w_t.shape[1]

    x2d = x.reshape(m, d_model)

    # Tile M (sublane-aligned); pad ragged remainder with zero rows.
    tm = min(tm, _round_up(m, 8))
    m_pad = _round_up(m, tm)
    if m_pad != m:
        x2d = jnp.pad(x2d, ((0, m_pad - m), (0, 0)))

    # VMEM footprint per step (f32, tm=512, d_model<=4096): x tile 2x ~8 MiB,
    # resident W ~2 MiB, out tile 2x ~256 KiB -> well under the 32 MiB scoped
    # default on every generation (v5e/v6e 128 MiB, v7x 64 MiB physical).
    out = pl.pallas_call(
        _linear_kernel,
        out_shape=jax.ShapeDtypeStruct((m_pad, p_pad), x.dtype),
        grid=(m_pad // tm,),
        in_specs=[
            pl.BlockSpec((tm, d_model), lambda i: (i, 0)),      # streamed x tile
            pl.BlockSpec((d_model, p_pad), lambda i: (0, 0)),   # resident weight
            pl.BlockSpec((1, p_pad), lambda i: (0, 0)),         # resident bias
        ],
        out_specs=pl.BlockSpec((tm, p_pad), lambda i: (i, 0)),
        compiler_params=pltpu.CompilerParams(
            dimension_semantics=("parallel",),  # M is embarrassingly parallel
        ),
    )(x2d, w_t, b2d)

    out = out[:m, :pose_dim]
    return out.reshape(*lead_shape, pose_dim)


def generator_forward(x, weight, bias):
    """Convenience wrapper matching nn.Linear(d_model, pose_dim) exactly.

    For repeated inference, call prepare_generator_params once and use
    generator_forward_prepared directly to avoid re-doing the transpose/pad.
    """
    w_t, b2d, pose_dim = prepare_generator_params(weight, bias)
    return generator_forward_prepared(x, w_t, b2d, pose_dim)


def init_generator_params(key, d_model, pose_dim, dtype=jnp.float32):
    """Deterministic init mirroring nn.Linear default (uniform +/- 1/sqrt(d_model))."""
    k_w, k_b = jax.random.split(key)
    bound = 1.0 / math.sqrt(d_model)
    weight = jax.random.uniform(k_w, (pose_dim, d_model), dtype,
                                minval=-bound, maxval=bound)
    bias = jax.random.uniform(k_b, (pose_dim,), dtype,
                              minval=-bound, maxval=bound)
    return weight, bias


if __name__ == "__main__":
    key = jax.random.PRNGKey(0)
    batch, seq, d_model, pose_dim = 2, 8, 32, 16

    k_x, k_p = jax.random.split(key)
    x = jax.random.normal(k_x, (batch, seq, d_model), jnp.float32)
    weight, bias = init_generator_params(k_p, d_model, pose_dim)

    # Prepare params once (transpose + lane padding), then run the kernel.
    w_t, b2d, pdim = prepare_generator_params(weight, bias)
    y = generator_forward_prepared(x, w_t, b2d, pdim)
    y = jax.block_until_ready(y)

    # Reference check against plain JAX (same math as nn.Linear forward).
    y_ref = x @ weight.T + bias
    assert y.shape == (batch, seq, pose_dim)
    assert jnp.allclose(y, y_ref, atol=1e-5, rtol=1e-5)

    print("KERNEL_OK")
</pallas_src>

<mosaic_0001>
module attributes {stable_mosaic.version = 11 : i64} {
  func.func @_linear_kernel(%arg0: i32, %arg1: memref<16x32xf32, #tpu.memory_space<vmem>>, %arg2: memref<32x128xf32, #tpu.memory_space<vmem>>, %arg3: memref<1x128xf32, #tpu.memory_space<vmem>>, %arg4: memref<16x128xf32, #tpu.memory_space<vmem>>) attributes {dimension_semantics = [#tpu.dimension_semantics<parallel>], iteration_bounds = array<i64: 1>, scalar_prefetch = 0 : i64, scratch_operands = 0 : i64, tpu.core_type = #tpu.core_type<tc>, window_params = [{transform_indices = @transform_0, window_bounds = array<i64: 16, 32>}, {pipeline_mode = #tpu.pipeline_mode<synchronous>, transform_indices = @transform_1, window_bounds = array<i64: 32, 128>}, {pipeline_mode = #tpu.pipeline_mode<synchronous>, transform_indices = @transform_2, window_bounds = array<i64: 1, 128>}, {transform_indices = @transform_3, window_bounds = array<i64: 16, 128>}]} {
    %c0 = arith.constant 0 : index
    %c0_0 = arith.constant 0 : index
    %0 = vector.load %arg1[%c0, %c0_0] : memref<16x32xf32, #tpu.memory_space<vmem>>, vector<16x32xf32>
    %c0_1 = arith.constant 0 : index
    %c0_2 = arith.constant 0 : index
    %1 = vector.load %arg2[%c0_1, %c0_2] : memref<32x128xf32, #tpu.memory_space<vmem>>, vector<32x128xf32>
    %cst = arith.constant dense<0.000000e+00> : vector<16x128xf32>
    %2 = tpu.matmul %0, %1, %cst {dimension_numbers = #tpu.dot_dimension_numbers<[1], [0], [0], [1], [0, 0, 1, 1], [], []>} : vector<16x32xf32>, vector<32x128xf32>, vector<16x128xf32> -> vector<16x128xf32>
    %c0_3 = arith.constant 0 : index
    %c0_4 = arith.constant 0 : index
    %3 = vector.load %arg3[%c0_3, %c0_4] : memref<1x128xf32, #tpu.memory_space<vmem>>, vector<1x128xf32>
    %4 = vector.broadcast %3 : vector<1x128xf32> to vector<16x128xf32>
    %5 = arith.addf %2, %4 : vector<16x128xf32>
    %c0_5 = arith.constant 0 : index
    %c0_6 = arith.constant 0 : index
    %6 = vector.load %arg4[%c0_5, %c0_6] : memref<16x128xf32, #tpu.memory_space<vmem>>, vector<16x128xf32>
    tpu.vector_store %arg4[%c0_5, %c0_6], %5 {strides = array<i32>} : memref<16x128xf32, #tpu.memory_space<vmem>>, vector<16x128xf32>,
    return
  }
  func.func @transform_0(%arg0: i32) -> (i32, i32) {
    %c0_i32 = arith.constant 0 : i32
    %c0_i32_0 = arith.constant 0 : i32
    return %arg0, %c0_i32 : i32, i32
  }
  func.func @transform_1(%arg0: i32) -> (i32, i32) {
    %c0_i32 = arith.constant 0 : i32
    %c0_i32_0 = arith.constant 0 : i32
    %c0_i32_1 = arith.constant 0 : i32
    return %c0_i32, %c0_i32_0 : i32, i32
  }
  func.func @transform_2(%arg0: i32) -> (i32, i32) {
    %c0_i32 = arith.constant 0 : i32
    %c0_i32_0 = arith.constant 0 : i32
    %c0_i32_1 = arith.constant 0 : i32
    return %c0_i32, %c0_i32_0 : i32, i32
  }
  func.func @transform_3(%arg0: i32) -> (i32, i32) {
    %c0_i32 = arith.constant 0 : i32
    %c0_i32_0 = arith.constant 0 : i32
    return %arg0, %c0_i32 : i32, i32
  }
}

</mosaic_0001>

<bundles_post_ra>
// kernel: tpu_custom_call.1
= control target key start
LH: loop header
LB: loop body
LE: loop exit
PB: predicated region body
PF: predicated region fallthrough
CT: control target
= control target key end

     0   :  { %8 = vsyncpa [#allocation3], 0  ;;  %s336_s0 = inlined_call_operand.hbm [shape: f32[16,32], index: 0, kind: input, shape index: {}]   ;;  %s337_s1 = inlined_call_operand.hbm [shape: f32[32,128], index: 1, kind: input, shape index: {}]   ;;  %s338_s2 = inlined_call_operand.vmem [shape: f32[1,128], index: 2, kind: input, shape index: {}]   ;;  %s339_s3 = inlined_call_operand.hbm [shape: f32[16,128], index: 3, kind: output, shape index: {}]  }
   0x1   :  { %9 = vsyncpa [#allocation6], 0 }
   0x2   :  { %10 = vsyncpa [#allocation4], 0  ;;  %s263_s12 = smov [#allocation2]   ;;  %s191_s16 = scalar_lea.hbm %s336_s0, 256 }
   0x3   :  { %s16_s13 = sshll.u32 %s263_s12, 4  ;;  %p192_p0 = scmp.ne.s32.totalorder %s336_s0, %s191_s16  ;;  %s17_s13 = int_to_ptr.vmem [resolvable:$true] %s16_s13 }
   0x4   :  { %p195_p1 = scmp.lt.u32.totalorder %s191_s16, %s336_s0 }
   0x6   :  { %p197_p2 = pnand %p195_p1, %p192_p0 }
   0x8   :  { %200 = shalt.err (!%p197_p2)
}
   0x9   :  { %s201_s21 = scalar_lea.vmem %s17_s13, 256  ;;  %p206_p4 = scmp.lt.s32.totalorder %s17_s13, %s17_s13 }
   0xa   :  { %p202_p3 = scmp.ne.s32.totalorder %s17_s13, %s201_s21  ;;  %p207_p5 = scmp.lt.s32.totalorder %s201_s21, %s201_s21 }
   0xc   :  { %p208_p6 = por %p207_p5, %p206_p4 }
   0xe   :  { %p209_p7 = pnand %p208_p6, %p202_p3 }
  0x10   :  { %212 = shalt.err (!%p209_p7)
}
  0x11   :  { %s264_s22 = smov 128   ;;  %s265_s23 = smov 8  }
  0x12   :  { %22 = dma.hbm_to_vmem [thread:$0]  %s336_s0, 256, %s17_s13, [#allocation3], %s264_s22, %s264_s22, %s265_s23  }
  0x13   :  { %s266_s26 = smov [#allocation5]   ;;  %s213_s30 = scalar_lea.hbm %s337_s1, 512 }
  0x14   :  { %s28_s27 = sshll.u32 %s266_s26, 4  ;;  %p214_p8 = scmp.ne.s32.totalorder %s337_s1, %s213_s30  ;;  %s29_s27 = int_to_ptr.vmem [resolvable:$true] %s28_s27 }
  0x15   :  { %p217_p9 = scmp.lt.u32.totalorder %s213_s30, %s337_s1 }
  0x17   :  { %p219_p10 = pnand %p217_p9, %p214_p8 }
  0x19   :  { %222 = shalt.err (!%p219_p10)
}
  0x1a   :  { %s223_s8 = scalar_lea.vmem %s29_s27, 512  ;;  %p228_p12 = scmp.lt.s32.totalorder %s29_s27, %s29_s27 }
  0x1b   :  { %p224_p11 = scmp.ne.s32.totalorder %s29_s27, %s223_s8  ;;  %p229_p13 = scmp.lt.s32.totalorder %s223_s8, %s223_s8 }
  0x1d   :  { %p230_p0 = por %p229_p13, %p228_p12 }
  0x1f   :  { %p231_p1 = pnand %p230_p0, %p224_p11 }
  0x21   :  { %234 = shalt.err (!%p231_p1)
}
  0x22   :  { %34 = dma.hbm_to_vmem [thread:$0]  %s337_s1, 512, %s29_s27, [#allocation6], %s264_s22, %s264_s22, %s265_s23  }
  0x23   :  { %257 = dma.done.wait [#allocation3], 256  }
  0x24   :  { %258 = vsyncadd [#allocation3], 4294967040 }
  0x25   :  { %259 = dma.done.wait [#allocation6], 512  }
  0x26   :  { %260 = vsyncadd [#allocation6], 4294966784  ;;  %vm56_vm0 = vcmask 261120   ;;  %v45_v0 = vld [vmem:[#allocation5] sm:$0xff]  ;;  %v46_v1 = vld [vmem:[#allocation5 + $0x8] sm:$0xff]  ;;  %s267_s11 = smov [#allocation7]  }
  0x27   :  { %v47_v2 = vld [vmem:[#allocation5 + $0x10] sm:$0xff]  ;;  %v178_v3 = vpack.c.bf16 %v46_v1, %v45_v0  ;;  %v48_v4 = vld [vmem:[#allocation5 + $0x18] sm:$0xff]  ;;  %s145_s12 = sshll.u32 %s267_s11, 4  ;;  %s146_s12 = int_to_ptr.vmem [resolvable:$true] %s145_s12 }
  0x28   :  { %v43_v5 = vld [vmem:[#allocation2] sm:$0xff]  ;;  %v182_v6 = vpack.c.bf16 %v48_v4, %v47_v2  ;;  %v44_v7 = vld [vmem:[#allocation2 + $0x8] sm:$0xff]  ;;  %s235_s13 = scalar_lea.vmem %s146_s12, 256  ;;  %p240_p3 = scmp.lt.s32.totalorder %s146_s12, %s146_s12 }
  0x29   :  { %175 = vmatprep.mubr.msk.f32.mxu0 %vm56_vm0, %v43_v5  ;;  %179 = vmatprep.subr.bf16.mxu0 %v178_v3  ;;  %v158_v8 = vld [vmem:[%s338_s2] ss:$0 sm:$0xff]  ;;  %p236_p2 = scmp.ne.s32.totalorder %s146_s12, %s235_s13  ;;  %p241_p4 = scmp.lt.s32.totalorder %s235_s13, %s235_s13 }
  0x2a   :  { %181 = vmatpush3.bf16.msra.mxu0 %v178_v3 }
  0x2b   :  { %183 = vmatprep.subr.bf16.mxu0 %v182_v6  ;;  %p242_p5 = por %p241_p4, %p240_p3 }
  0x2d   :  { %p243_p6 = pnand %p242_p5, %p236_p2 }
  0x2e   :  { %185 = vmatpush3.bf16.msra.mxu0 %v182_v6 }
  0x31   :  { %176 = vmatmul.mubr.msk.f32.vlgmr.msra.gmra.mrb[0].mxu0 %vm56_vm0, %v44_v7 }
 0x104   :  { %v177_v9 = vpop.f32.mrb[0].mxu0 }
 0x105   :  { %v135_v10 = vadd.f32 %v177_v9, %v158_v8  ;;  %v129_v11 = vpop.f32.mrb[1].mxu0 }
 0x106   :  { %v130_v12 = vadd.f32 %v158_v8, %v129_v11 }
 0x107   :  { %139 = vst [vmem:[#allocation7 + $0x8] sm:$0xff] %v135_v10 }
 0x108   :  { %138 = vst [vmem:[#allocation7] sm:$0xff] %v130_v12 }
 0x109   :  { %246 = shalt.err (!%p243_p6)
}
 0x10a   :  { %s247_s2 = scalar_lea.hbm %s339_s3, 256 }
 0x10b   :  { %p248_p7 = scmp.ne.s32.totalorder %s339_s3, %s247_s2  ;;  %p251_p8 = scmp.lt.u32.totalorder %s247_s2, %s339_s3 }
 0x10d   :  { %p253_p9 = pnand %p251_p8, %p248_p7 }
 0x10f   :  { %256 = shalt.err (!%p253_p9)
}
 0x110   :  { %151 = dma.vmem_to_hbm [thread:$0]  %s146_s12, 256, %s339_s3, [#allocation4], %s264_s22, %s264_s22, %s265_s23  }
 0x111   :  { %261 = dma.done.wait [#allocation4], 256  }
 0x112   :  { %262 = vsyncadd [#allocation4], 4294967040 }
 0x113   :  { %155 = vsyncpa [#allocation3], 1 }
 0x114   :  { %156 = vsyncpa [#allocation6], 1 }
 0x115   :  { %157 = vsyncpa [#allocation4], 1 }

</bundles_post_ra>
